<compile_context>
chip_gen: v5e
topology: v5e:2x2
jax: 0.10.0
libtpu: 0.0.40
codegen_flags: <defaults>
</compile_context>

<pallas_src>
import jax
import jax.numpy as jnp
from jax.experimental import pallas as pl
from jax.experimental.pallas import tpu as pltpu

D_IN = 784       # 1*28*28
REAL_HID = 200
REAL_OUT = 10
D_HID = 256      # 200 padded to lane-exact 256
D_OUT = 128      # 10 padded to lane-exact 128


def mlp_kernel(x_ref, w1_ref, b1_ref, w2_ref, b2_ref, w3_ref, b3_ref, o_ref):
    # x: (TM, 784) f32 -> bf16 in-kernel; weights bf16; biases f32; out bf16.
    x = x_ref[...].astype(jnp.bfloat16)                          # one VPU pack per tile

    h1 = jnp.dot(x, w1_ref[...], preferred_element_type=jnp.float32)
    h1 = jnp.maximum(h1 + b1_ref[...], 0.0)                      # ReLU(fc1), f32

    h2 = jnp.dot(h1.astype(jnp.bfloat16), w2_ref[...],
                 preferred_element_type=jnp.float32)
    h2 = jnp.maximum(h2 + b2_ref[...], 0.0)                      # ReLU(fc2), f32

    h3 = jnp.dot(h2.astype(jnp.bfloat16), w3_ref[...],
                 preferred_element_type=jnp.float32)
    o_ref[...] = (h3 + b3_ref[...]).astype(jnp.bfloat16)         # fc3, lane-dense bf16 store


def _round_up(n, m):
    return ((n + m - 1) // m) * m


def _choose_tm(B):
    """Pick the batch tile.

    B <= 32: single full-extent block (block dim == array dim, so no (8,128)
    divisibility requirement, no padding, no masked stores).
    Larger B: multiple-of-16 tile (bf16 sublane packing), capped at 1024 rows
    so per-step VMEM stays ~14 MB, and sized to ceil(B/2) so the grid has at
    least 2 steps (lets v7x shard the "parallel" axis across both TensorCores).
    """
    if B <= 32:
        return B
    half = -(-B // 2)                      # ceil(B/2) -> grid length >= 2
    return min(1024, _round_up(half, 16))


def _pad_params(params):
    """Zero-pad params to lane-exact shapes; cast weights to bf16, biases stay f32."""
    w1, b1, w2, b2, w3, b3 = params
    w1p = jnp.zeros((D_IN, D_HID), jnp.float32).at[:, :REAL_HID].set(w1)
    b1p = jnp.zeros((1, D_HID), jnp.float32).at[:, :REAL_HID].set(b1)
    w2p = jnp.zeros((D_HID, D_HID), jnp.float32).at[:REAL_HID, :REAL_HID].set(w2)
    b2p = jnp.zeros((1, D_HID), jnp.float32).at[:, :REAL_HID].set(b2)
    w3p = jnp.zeros((D_HID, D_OUT), jnp.float32).at[:REAL_HID, :REAL_OUT].set(w3)
    b3p = jnp.zeros((1, D_OUT), jnp.float32).at[:, :REAL_OUT].set(b3)
    return (w1p.astype(jnp.bfloat16), b1p,
            w2p.astype(jnp.bfloat16), b2p,
            w3p.astype(jnp.bfloat16), b3p)


def net_forward(x_nchw, params):
    """Flatten NCHW input and run the batch-tiled fused 3-layer MLP kernel."""
    w1, b1, w2, b2, w3, b3 = _pad_params(params)

    B = x_nchw.shape[0]
    flat = x_nchw.shape[1] * x_nchw.shape[-2] * x_nchw.shape[-1]  # C*H*W = 784
    x = x_nchw.reshape(B, flat)            # stays f32; bf16 cast happens in-kernel

    TM = _choose_tm(B)
    grid = (pl.cdiv(B, TM),)               # partial last tile handled by masked store

    flops = 2 * B * (D_IN * D_HID + D_HID * D_HID + D_HID * D_OUT)
    bytes_accessed = (
        x.size * x.dtype.itemsize
        + sum(int(a.size) * a.dtype.itemsize for a in (w1, b1, w2, b2, w3, b3))
        + B * D_OUT * 2)

    out = pl.pallas_call(
        mlp_kernel,
        out_shape=jax.ShapeDtypeStruct((B, D_OUT), jnp.bfloat16),
        grid=grid,
        in_specs=[
            pl.BlockSpec((TM, D_IN), lambda i: (i, 0)),       # x: streamed f32 batch tiles
            pl.BlockSpec((D_IN, D_HID), lambda i: (0, 0)),    # w1: VMEM-resident
            pl.BlockSpec((1, D_HID), lambda i: (0, 0)),       # b1
            pl.BlockSpec((D_HID, D_HID), lambda i: (0, 0)),   # w2
            pl.BlockSpec((1, D_HID), lambda i: (0, 0)),       # b2
            pl.BlockSpec((D_HID, D_OUT), lambda i: (0, 0)),   # w3
            pl.BlockSpec((1, D_OUT), lambda i: (0, 0)),       # b3
        ],
        out_specs=pl.BlockSpec((TM, D_OUT), lambda i: (i, 0)),
        compiler_params=pltpu.CompilerParams(
            dimension_semantics=("parallel",)),
        cost_estimate=pl.CostEstimate(
            flops=flops, transcendentals=0, bytes_accessed=bytes_accessed),
    )(x, w1, b1, w2, b2, w3, b3)

    return out[:B, :REAL_OUT].astype(jnp.float32)


def init_params(key):
    """Deterministic init matching nn.Linear's U(-1/sqrt(fan_in), 1/sqrt(fan_in))."""
    dims = [(D_IN, REAL_HID), (REAL_HID, REAL_HID), (REAL_HID, REAL_OUT)]
    params = []
    for (fan_in, fan_out) in dims:
        key, kw, kb = jax.random.split(key, 3)
        bound = 1.0 / jnp.sqrt(jnp.float32(fan_in))
        w = jax.random.uniform(kw, (fan_in, fan_out), jnp.float32, -bound, bound)
        b = jax.random.uniform(kb, (1, fan_out), jnp.float32, -bound, bound)
        params += [w, b]
    return tuple(params)


def _reference_f32(x_nchw, params):
    """Pure-JAX f32 reference (matches the PyTorch module exactly)."""
    w1, b1, w2, b2, w3, b3 = params
    B = x_nchw.shape[0]
    x = x_nchw.reshape(B, -1).astype(jnp.float32)
    h = jnp.maximum(x @ w1 + b1, 0.0)
    h = jnp.maximum(h @ w2 + b2, 0.0)
    return h @ w3 + b3


def _reference_bf16(x_nchw, params):
    """Pure-JAX reference replicating the kernel's bf16 matmul / f32 accumulate math."""
    w1, b1, w2, b2, w3, b3 = params
    B = x_nchw.shape[0]
    x = x_nchw.reshape(B, -1).astype(jnp.bfloat16)
    h = jnp.maximum(jnp.dot(x, w1.astype(jnp.bfloat16),
                            preferred_element_type=jnp.float32) + b1, 0.0)
    h = jnp.maximum(jnp.dot(h.astype(jnp.bfloat16), w2.astype(jnp.bfloat16),
                            preferred_element_type=jnp.float32) + b2, 0.0)
    out = jnp.dot(h.astype(jnp.bfloat16), w3.astype(jnp.bfloat16),
                  preferred_element_type=jnp.float32) + b3
    return out.astype(jnp.bfloat16).astype(jnp.float32)   # kernel stores bf16


if __name__ == "__main__":
    key = jax.random.PRNGKey(0)
    key, kx = jax.random.split(key)

    # MNIST-like input: (B, C, H, W) = (2, 1, 28, 28) -> 784 features
    x = jax.random.normal(kx, (2, 1, 28, 28), jnp.float32)
    params = init_params(key)

    out = net_forward(x, params)
    jax.block_until_ready(out)
    assert out.shape == (2, REAL_OUT), out.shape

    # Tight check against a reference using the same bf16-matmul / bf16-store math.
    ref_bf16 = _reference_bf16(x, params)
    assert jnp.allclose(out, ref_bf16, atol=2e-3, rtol=2e-3), \
        "mismatch vs bf16 reference"

    # Loose check against the exact f32 PyTorch-equivalent math (bf16 rounding only).
    ref_f32 = _reference_f32(x, params)
    assert jnp.allclose(out, ref_f32, atol=5e-2, rtol=5e-2), \
        "mismatch vs f32 reference"

    print("KERNEL_OK")
</pallas_src>

<mosaic_0001>
module attributes {stable_mosaic.version = 11 : i64} {
  func.func @mlp_kernel(%arg0: i32, %arg1: memref<2x784xf32, #tpu.memory_space<vmem>>, %arg2: memref<784x256xbf16, #tpu.memory_space<vmem>>, %arg3: memref<1x256xf32, #tpu.memory_space<vmem>>, %arg4: memref<256x256xbf16, #tpu.memory_space<vmem>>, %arg5: memref<1x256xf32, #tpu.memory_space<vmem>>, %arg6: memref<256x128xbf16, #tpu.memory_space<vmem>>, %arg7: memref<1x128xf32, #tpu.memory_space<vmem>>, %arg8: memref<2x128xbf16, #tpu.memory_space<vmem>>) attributes {dimension_semantics = [#tpu.dimension_semantics<parallel>], iteration_bounds = array<i64: 1>, scalar_prefetch = 0 : i64, scratch_operands = 0 : i64, tpu.core_type = #tpu.core_type<tc>, window_params = [{transform_indices = @transform_0, window_bounds = array<i64: 2, 784>}, {pipeline_mode = #tpu.pipeline_mode<synchronous>, transform_indices = @transform_1, window_bounds = array<i64: 784, 256>}, {pipeline_mode = #tpu.pipeline_mode<synchronous>, transform_indices = @transform_2, window_bounds = array<i64: 1, 256>}, {pipeline_mode = #tpu.pipeline_mode<synchronous>, transform_indices = @transform_3, window_bounds = array<i64: 256, 256>}, {pipeline_mode = #tpu.pipeline_mode<synchronous>, transform_indices = @transform_4, window_bounds = array<i64: 1, 256>}, {pipeline_mode = #tpu.pipeline_mode<synchronous>, transform_indices = @transform_5, window_bounds = array<i64: 256, 128>}, {pipeline_mode = #tpu.pipeline_mode<synchronous>, transform_indices = @transform_6, window_bounds = array<i64: 1, 128>}, {transform_indices = @transform_7, window_bounds = array<i64: 2, 128>}]} {
    %c0 = arith.constant 0 : index
    %c0_0 = arith.constant 0 : index
    %0 = vector.load %arg1[%c0, %c0_0] : memref<2x784xf32, #tpu.memory_space<vmem>>, vector<2x784xf32>
    %1 = arith.truncf %0 : vector<2x784xf32> to vector<2x784xbf16>
    %c0_1 = arith.constant 0 : index
    %c0_2 = arith.constant 0 : index
    %2 = vector.load %arg2[%c0_1, %c0_2] : memref<784x256xbf16, #tpu.memory_space<vmem>>, vector<784x256xbf16>
    %cst = arith.constant dense<0.000000e+00> : vector<2x256xf32>
    %3 = tpu.matmul %1, %2, %cst {dimension_numbers = #tpu.dot_dimension_numbers<[1], [0], [0], [1], [0, 0, 1, 1], [], []>} : vector<2x784xbf16>, vector<784x256xbf16>, vector<2x256xf32> -> vector<2x256xf32>
    %c0_3 = arith.constant 0 : index
    %c0_4 = arith.constant 0 : index
    %4 = vector.load %arg3[%c0_3, %c0_4] : memref<1x256xf32, #tpu.memory_space<vmem>>, vector<1x256xf32>
    %5 = vector.broadcast %4 : vector<1x256xf32> to vector<2x256xf32>
    %6 = arith.addf %3, %5 : vector<2x256xf32>
    %cst_5 = arith.constant 0.000000e+00 : f32
    %7 = vector.broadcast %cst_5 : f32 to vector<2x256xf32>
    %8 = arith.maximumf %6, %7 : vector<2x256xf32>
    %9 = arith.truncf %8 : vector<2x256xf32> to vector<2x256xbf16>
    %c0_6 = arith.constant 0 : index
    %c0_7 = arith.constant 0 : index
    %10 = vector.load %arg4[%c0_6, %c0_7] : memref<256x256xbf16, #tpu.memory_space<vmem>>, vector<256x256xbf16>
    %cst_8 = arith.constant dense<0.000000e+00> : vector<2x256xf32>
    %11 = tpu.matmul %9, %10, %cst_8 {dimension_numbers = #tpu.dot_dimension_numbers<[1], [0], [0], [1], [0, 0, 1, 1], [], []>} : vector<2x256xbf16>, vector<256x256xbf16>, vector<2x256xf32> -> vector<2x256xf32>
    %c0_9 = arith.constant 0 : index
    %c0_10 = arith.constant 0 : index
    %12 = vector.load %arg5[%c0_9, %c0_10] : memref<1x256xf32, #tpu.memory_space<vmem>>, vector<1x256xf32>
    %13 = vector.broadcast %12 : vector<1x256xf32> to vector<2x256xf32>
    %14 = arith.addf %11, %13 : vector<2x256xf32>
    %cst_11 = arith.constant 0.000000e+00 : f32
    %15 = vector.broadcast %cst_11 : f32 to vector<2x256xf32>
    %16 = arith.maximumf %14, %15 : vector<2x256xf32>
    %17 = arith.truncf %16 : vector<2x256xf32> to vector<2x256xbf16>
    %c0_12 = arith.constant 0 : index
    %c0_13 = arith.constant 0 : index
    %18 = vector.load %arg6[%c0_12, %c0_13] : memref<256x128xbf16, #tpu.memory_space<vmem>>, vector<256x128xbf16>
    %cst_14 = arith.constant dense<0.000000e+00> : vector<2x128xf32>
    %19 = tpu.matmul %17, %18, %cst_14 {dimension_numbers = #tpu.dot_dimension_numbers<[1], [0], [0], [1], [0, 0, 1, 1], [], []>} : vector<2x256xbf16>, vector<256x128xbf16>, vector<2x128xf32> -> vector<2x128xf32>
    %c0_15 = arith.constant 0 : index
    %c0_16 = arith.constant 0 : index
    %20 = vector.load %arg7[%c0_15, %c0_16] : memref<1x128xf32, #tpu.memory_space<vmem>>, vector<1x128xf32>
    %21 = vector.broadcast %20 : vector<1x128xf32> to vector<2x128xf32>
    %22 = arith.addf %19, %21 : vector<2x128xf32>
    %23 = arith.truncf %22 : vector<2x128xf32> to vector<2x128xbf16>
    %c0_17 = arith.constant 0 : index
    %c0_18 = arith.constant 0 : index
    %24 = vector.load %arg8[%c0_17, %c0_18] : memref<2x128xbf16, #tpu.memory_space<vmem>>, vector<2x128xbf16>
    tpu.vector_store %arg8[%c0_17, %c0_18], %23 {strides = array<i32>} : memref<2x128xbf16, #tpu.memory_space<vmem>>, vector<2x128xbf16>,
    return
  }
  func.func @transform_0(%arg0: i32) -> (i32, i32) {
    %c0_i32 = arith.constant 0 : i32
    %c0_i32_0 = arith.constant 0 : i32
    return %arg0, %c0_i32 : i32, i32
  }
  func.func @transform_1(%arg0: i32) -> (i32, i32) {
    %c0_i32 = arith.constant 0 : i32
    %c0_i32_0 = arith.constant 0 : i32
    %c0_i32_1 = arith.constant 0 : i32
    return %c0_i32, %c0_i32_0 : i32, i32
  }
  func.func @transform_2(%arg0: i32) -> (i32, i32) {
    %c0_i32 = arith.constant 0 : i32
    %c0_i32_0 = arith.constant 0 : i32
    %c0_i32_1 = arith.constant 0 : i32
    return %c0_i32, %c0_i32_0 : i32, i32
  }
  func.func @transform_3(%arg0: i32) -> (i32, i32) {
    %c0_i32 = arith.constant 0 : i32
    %c0_i32_0 = arith.constant 0 : i32
    %c0_i32_1 = arith.constant 0 : i32
    return %c0_i32, %c0_i32_0 : i32, i32
  }
  func.func @transform_4(%arg0: i32) -> (i32, i32) {
    %c0_i32 = arith.constant 0 : i32
    %c0_i32_0 = arith.constant 0 : i32
    %c0_i32_1 = arith.constant 0 : i32
    return %c0_i32, %c0_i32_0 : i32, i32
  }
  func.func @transform_5(%arg0: i32) -> (i32, i32) {
    %c0_i32 = arith.constant 0 : i32
    %c0_i32_0 = arith.constant 0 : i32
    %c0_i32_1 = arith.constant 0 : i32
    return %c0_i32, %c0_i32_0 : i32, i32
  }
  func.func @transform_6(%arg0: i32) -> (i32, i32) {
    %c0_i32 = arith.constant 0 : i32
    %c0_i32_0 = arith.constant 0 : i32
    %c0_i32_1 = arith.constant 0 : i32
    return %c0_i32, %c0_i32_0 : i32, i32
  }
  func.func @transform_7(%arg0: i32) -> (i32, i32) {
    %c0_i32 = arith.constant 0 : i32
    %c0_i32_0 = arith.constant 0 : i32
    return %arg0, %c0_i32 : i32, i32
  }
}

</mosaic_0001>

<bundles_post_ra>
// kernel: tpu_custom_call.1
= control target key start
LH: loop header
LB: loop body
LE: loop exit
PB: predicated region body
PF: predicated region fallthrough
CT: control target
= control target key end

     0   :  { %12 = vsyncpa [#allocation3], 0  ;;  %s2350_s0 = inlined_call_operand.hbm [shape: f32[2,784], index: 0, kind: input, shape index: {}]   ;;  %s2351_s1 = inlined_call_operand.hbm [shape: bf16[784,256], index: 1, kind: input, shape index: {}]   ;;  %s2352_s2 = inlined_call_operand.hbm [shape: f32[1,256], index: 2, kind: input, shape index: {}]   ;;  %s2353_s3 = inlined_call_operand.hbm [shape: bf16[256,256], index: 3, kind: input, shape index: {}]   ;;  %s2354_s4 = inlined_call_operand.vmem [shape: f32[1,256], index: 4, kind: input, shape index: {}]   ;;  %s2355_s5 = inlined_call_operand.hbm [shape: bf16[256,128], index: 5, kind: input, shape index: {}]   ;;  %s2356_s6 = inlined_call_operand.vmem [shape: f32[1,128], index: 6, kind: input, shape index: {}]   ;;  %s2357_s7 = inlined_call_operand.hbm [shape: bf16[2,128], index: 7, kind: output, shape index: {}]  }
   0x1   :  { %13 = vsyncpa [#allocation6], 0 }
   0x2   :  { %14 = vsyncpa [#allocation9], 0  ;;  %s31_s26 = sshll.u32 %s2351_s1, 4  ;;  %s32_s26 = int_to_ptr.hbm [resolvable:$true] %s31_s26 }
   0x3   :  { %15 = vsyncpa [#allocation4], 0  ;;  %s2242_s27 = smov [#allocation5]   ;;  %s55_s8 = sshll.u32 %s2353_s3, 4  ;;  %s56_s8 = int_to_ptr.hbm [resolvable:$true] %s55_s8 }
   0x4   :  { %s33_s28 = sshll.u32 %s2242_s27, 4  ;;  %s2243_s9 = smov 128   ;;  %s34_s28 = int_to_ptr.vmem [resolvable:$true] %s33_s28 }
   0x5   :  { %s2244_s10 = smov 8   ;;  %s2245_s11 = smov [#allocation8]  }
   0x6   :  { %39 = dma.hbm_to_vmem [thread:$0]  %s32_s26, 12544, %s34_s28, [#allocation6], %s2243_s9, %s2243_s9, %s2244_s10  }
   0x7   :  { %s57_s12 = sshll.u32 %s2245_s11, 4  ;;  %s21_s15 = sshll.u32 %s2350_s0, 4  ;;  %s58_s12 = int_to_ptr.vmem [resolvable:$true] %s57_s12  ;;  %s22_s15 = int_to_ptr.hbm [resolvable:$true] %s21_s15 }
   0x8   :  { %63 = dma.hbm_to_vmem [thread:$0]  %s56_s8, 4096, %s58_s12, [#allocation9], %s2243_s9, %s2243_s9, %s2244_s10  }
   0x9   :  { %s45_s17 = sshll.u32 %s2352_s2, 4  ;;  %s2246_s18 = smov [#allocation2]   ;;  %s46_s17 = int_to_ptr.hbm [resolvable:$true] %s45_s17 }
   0xa   :  { %s23_s19 = sshll.u32 %s2246_s18, 4  ;;  %s2247_s3 = smov [#allocation7]   ;;  %s24_s19 = int_to_ptr.vmem [resolvable:$true] %s23_s19 }
   0xb   :  { %26 = dma.hbm_to_vmem [thread:$0]  %s22_s15, 224, %s24_s19, [#allocation3]  }
   0xc   :  { %s47_s20 = sshll.u32 %s2247_s3, 4  ;;  %s70_s23 = sshll.u32 %s2355_s5, 4  ;;  %s48_s20 = int_to_ptr.vmem [resolvable:$true] %s47_s20  ;;  %s71_s23 = int_to_ptr.hbm [resolvable:$true] %s70_s23 }
   0xd   :  { %50 = dma.hbm_to_vmem [thread:$0]  %s46_s17, 32, %s48_s20, [#allocation6]  }
   0xe   :  { %s2248_s0 = smov [#allocation10]   ;;  %s2249_s25 = smov 64  }
   0xf   :  { %s72_s24 = sshll.u32 %s2248_s0, 4  ;;  %s2250_s26 = smov 4   ;;  %s73_s24 = int_to_ptr.vmem [resolvable:$true] %s72_s24 }
  0x10   :  { %78 = dma.hbm_to_vmem [thread:$0]  %s71_s23, 2048, %s73_s24, [#allocation9], %s2249_s25, %s2249_s25, %s2250_s26  }
  0x11   :  { %2234 = dma.done.wait [#allocation3], 224  }
  0x12   :  { %2235 = vsyncadd [#allocation3], 4294967072 }
  0x13   :  { %2236 = dma.done.wait [#allocation6], 12576  }
  0x14   :  { %2237 = vsyncadd [#allocation6], 4294954720 }
  0x15   :  { %2238 = dma.done.wait [#allocation9], 6144  }
  0x16   :  { %2239 = vsyncadd [#allocation9], 4294961152  ;;  %v1405_v0 = vld [vmem:[#allocation5 + $0x70] sm:$0xf]  ;;  %v1948_v1 = vld [vmem:[#allocation5 + $0x74] sm:$0xf0] }
  0x17   :  { %v1533_v2 = vld [vmem:[#allocation5 + $0x170] sm:$0xf]  ;;  %v1406_v3 = vor.u32 %v1948_v1, %v1405_v0  ;;  %v1980_v4 = vld [vmem:[#allocation5 + $0x174] sm:$0xf0]  ;;  %v1397_v11 = vld [vmem:[#allocation5 + $0x60] sm:$0xf] }
  0x18   :  { %v1597_v5 = vld [vmem:[#allocation5 + $0x1f0] sm:$0xf]  ;;  %v1996_v6 = vld [vmem:[#allocation5 + $0x1f4] sm:$0xf0]  ;;  %v1534_v7 = vor.u32 %v1980_v4, %v1533_v2  ;;  %v1946_v13 = vld [vmem:[#allocation5 + $0x64] sm:$0xf0] }
  0x19   :  { %v1598_v8 = vor.u32 %v1996_v6, %v1597_v5  ;;  %v1469_v9 = vld [vmem:[#allocation5 + $0xf0] sm:$0xf]  ;;  %v1964_v10 = vld [vmem:[#allocation5 + $0xf4] sm:$0xf0]  ;;  %728 = vmatpush.bf16.msra.mxu0 %v1406_v3  ;;  %v1525_v14 = vld [vmem:[#allocation5 + $0x160] sm:$0xf]  ;;  %v1398_v16 = vor.u32 %v1946_v13, %v1397_v11 }
  0x1a   :  { %v1470_v12 = vor.u32 %v1964_v10, %v1469_v9  ;;  %v1978_v15 = vld [vmem:[#allocation5 + $0x164] sm:$0xf0]  ;;  %754 = vmatpush.bf16.msra.mxu2 %v1534_v7  ;;  %v1589_v18 = vld [vmem:[#allocation5 + $0x1e0] sm:$0xf]  ;;  %v1389_v23 = vld [vmem:[#allocation5 + $0x50] sm:$0xf] }
  0x1b   :  { %767 = vmatpush.bf16.msra.mxu3 %v1598_v8  ;;  %v1526_v17 = vor.u32 %v1978_v15, %v1525_v14  ;;  %v1994_v19 = vld [vmem:[#allocation5 + $0x1e4] sm:$0xf0]  ;;  %v1461_v20 = vld [vmem:[#allocation5 + $0xe0] sm:$0xf]  ;;  %v1944_v24 = vld [vmem:[#allocation5 + $0x54] sm:$0xf0] }
  0x1c   :  { %741 = vmatpush.bf16.msra.mxu1 %v1470_v12  ;;  %v1590_v21 = vor.u32 %v1994_v19, %v1589_v18  ;;  %v1962_v22 = vld [vmem:[#allocation5 + $0xe4] sm:$0xf0]  ;;  %v1517_v26 = vld [vmem:[#allocation5 + $0x150] sm:$0xf]  ;;  %v1976_v27 = vld [vmem:[#allocation5 + $0x154] sm:$0xf0]  ;;  %v1390_v29 = vor.u32 %v1944_v24, %v1389_v23 }
  0x1d   :  { %v1462_v25 = vor.u32 %v1962_v22, %v1461_v20  ;;  %v1581_v28 = vld [vmem:[#allocation5 + $0x1d0] sm:$0xf]  ;;  %729 = vmatpush.bf16.msra.mxu0 %v1398_v16  ;;  %v1992_v30 = vld [vmem:[#allocation5 + $0x1d4] sm:$0xf0]  ;;  %v1518_v33 = vor.u32 %v1976_v27, %v1517_v26  ;;  %v1381_v35 = vld [vmem:[#allocation5 + $0x40] sm:$0xf] }
  0x1e   :  { %v1453_v31 = vld [vmem:[#allocation5 + $0xd0] sm:$0xf]  ;;  %v1960_v32 = vld [vmem:[#allocation5 + $0xd4] sm:$0xf0]  ;;  %755 = vmatpush.bf16.msra.mxu2 %v1526_v17  ;;  %v1582_v34 = vor.u32 %v1992_v30, %v1581_v28  ;;  %v1942_v36 = vld [vmem:[#allocation5 + $0x44] sm:$0xf0] }
  0x1f   :  { %768 = vmatpush.bf16.msra.mxu3 %v1590_v21  ;;  %v1509_v37 = vld [vmem:[#allocation5 + $0x140] sm:$0xf]  ;;  %v1454_v38 = vor.u32 %v1960_v32, %v1453_v31  ;;  %v1974_v39 = vld [vmem:[#allocation5 + $0x144] sm:$0xf0]  ;;  %v1382_v44 = vor.u32 %v1942_v36, %v1381_v35  ;;  %v1373_v47 = vld [vmem:[#allocation5 + $0x30] sm:$0xf] }
  0x20   :  { %742 = vmatpush.bf16.msra.mxu1 %v1462_v25  ;;  %v1573_v40 = vld [vmem:[#allocation5 + $0x1c0] sm:$0xf]  ;;  %v1990_v41 = vld [vmem:[#allocation5 + $0x1c4] sm:$0xf0]  ;;  %v1510_v45 = vor.u32 %v1974_v39, %v1509_v37  ;;  %v1940_v48 = vld [vmem:[#allocation5 + $0x34] sm:$0xf0] }
  0x21   :  { %v1445_v42 = vld [vmem:[#allocation5 + $0xc0] sm:$0xf]  ;;  %v1958_v43 = vld [vmem:[#allocation5 + $0xc4] sm:$0xf0]  ;;  %730 = vmatpush.bf16.msra.mxu0 %v1390_v29  ;;  %v1574_v46 = vor.u32 %v1990_v41, %v1573_v40  ;;  %v1501_v49 = vld [vmem:[#allocation5 + $0x130] sm:$0xf]  ;;  %v1374_v56 = vor.u32 %v1940_v48, %v1373_v47 }
  0x22   :  { %756 = vmatpush.bf16.msra.mxu2 %v1518_v33  ;;  %v1446_v50 = vor.u32 %v1958_v43, %v1445_v42  ;;  %v1972_v51 = vld [vmem:[#allocation5 + $0x134] sm:$0xf0]  ;;  %v1565_v52 = vld [vmem:[#allocation5 + $0x1b0] sm:$0xf]  ;;  %v1365_v59 = vld [vmem:[#allocation5 + $0x20] sm:$0xf] }
  0x23   :  { %769 = vmatpush.bf16.msra.mxu3 %v1582_v34  ;;  %v1988_v53 = vld [vmem:[#allocation5 + $0x1b4] sm:$0xf0]  ;;  %v1437_v54 = vld [vmem:[#allocation5 + $0xb0] sm:$0xf]  ;;  %v1502_v57 = vor.u32 %v1972_v51, %v1501_v49  ;;  %v1938_v60 = vld [vmem:[#allocation5 + $0x24] sm:$0xf0] }
  0x24   :  { %743 = vmatpush.bf16.msra.mxu1 %v1454_v38  ;;  %v1956_v55 = vld [vmem:[#allocation5 + $0xb4] sm:$0xf0]  ;;  %v1566_v58 = vor.u32 %v1988_v53, %v1565_v52  ;;  %v1493_v61 = vld [vmem:[#allocation5 + $0x120] sm:$0xf]  ;;  %v1970_v63 = vld [vmem:[#allocation5 + $0x124] sm:$0xf0]  ;;  %v1366_v4 = vor.u32 %v1938_v60, %v1365_v59 }
  0x25   :  { %731 = vmatpush.bf16.msra.mxu0 %v1382_v44  ;;  %v1438_v62 = vor.u32 %v1956_v55, %v1437_v54  ;;  %v1557_v0 = vld [vmem:[#allocation5 + $0x1a0] sm:$0xf]  ;;  %v1986_v1 = vld [vmem:[#allocation5 + $0x1a4] sm:$0xf0]  ;;  %v1357_v5 = vld [vmem:[#allocation5 + $0x10] sm:$0xf]  ;;  %v1494_v7 = vor.u32 %v1970_v63, %v1493_v61 }
  0x26   :  { %757 = vmatpush.bf16.msra.mxu2 %v1510_v45  ;;  %v1429_v2 = vld [vmem:[#allocation5 + $0xa0] sm:$0xf]  ;;  %v1954_v3 = vld [vmem:[#allocation5 + $0xa4] sm:$0xf0]  ;;  %v1936_v6 = vld [vmem:[#allocation5 + $0x14] sm:$0xf0]  ;;  %v1558_v8 = vor.u32 %v1986_v1, %v1557_v0 }
  0x27   :  { %770 = vmatpush.bf16.msra.mxu3 %v1574_v46  ;;  %v1485_v9 = vld [vmem:[#allocation5 + $0x110] sm:$0xf]  ;;  %v1968_v10 = vld [vmem:[#allocation5 + $0x114] sm:$0xf0]  ;;  %v1430_v12 = vor.u32 %v1954_v3, %v1429_v2  ;;  %v1349_v16 = vld [vmem:[#allocation5] sm:$0xf]  ;;  %v1358_v19 = vor.u32 %v1936_v6, %v1357_v5 }
  0x28   :  { %744 = vmatpush.bf16.msra.mxu1 %v1446_v50  ;;  %v1549_v11 = vld [vmem:[#allocation5 + $0x190] sm:$0xf]  ;;  %v1984_v13 = vld [vmem:[#allocation5 + $0x194] sm:$0xf0]  ;;  %v1934_v17 = vld [vmem:[#allocation5 + $0x4] sm:$0xf0]  ;;  %v1486_v22 = vor.u32 %v1968_v10, %v1485_v9 }
  0x29   :  { %732 = vmatpush.bf16.msra.mxu0 %v1374_v56  ;;  %v1421_v14 = vld [vmem:[#allocation5 + $0x90] sm:$0xf]  ;;  %v1952_v15 = vld [vmem:[#allocation5 + $0x94] sm:$0xf0]  ;;  %v1477_v20 = vld [vmem:[#allocation5 + $0x100] sm:$0xf]  ;;  %v1550_v23 = vor.u32 %v1984_v13, %v1549_v11  ;;  %v1350_v34 = vor.u32 %v1934_v17, %v1349_v16 }
  0x2a   :  { %758 = vmatpush.bf16.msra.mxu2 %v1502_v57  ;;  %v102_v18 = vld [vmem:[#allocation2] sm:$0xff]  ;;  %v1966_v21 = vld [vmem:[#allocation5 + $0x104] sm:$0xf0]  ;;  %v1541_v24 = vld [vmem:[#allocation5 + $0x180] sm:$0xf]  ;;  %v1422_v27 = vor.u32 %v1952_v15, %v1421_v14  ;;  %vm724_vm0 = vcmask 130048  }
  0x2b   :  { %771 = vmatpush.bf16.msra.mxu3 %v1566_v58  ;;  %106 = vst [vmem:[#allocation1] ss:$4 sm:$0xff] %v102_v18  ;;  %v1982_v25 = vld [vmem:[#allocation5 + $0x184] sm:$0xf0]  ;;  %v1661_v26 = vld [vmem:[#allocation5 + $0x270] sm:$0xf]  ;;  %v1478_v38 = vor.u32 %v1966_v21, %v1477_v20 }
  0x2c   :  { %745 = vmatpush.bf16.msra.mxu1 %v1438_v62  ;;  %v2012_v28 = vld [vmem:[#allocation5 + $0x274] sm:$0xf0]  ;;  %v1947_v29 = vld [vmem:[#allocation5 + $0x74] sm:$0xf]  ;;  %v1407_v30 = vld [vmem:[#allocation5 + $0x78] sm:$0xf0]  ;;  %v1542_v39 = vor.u32 %v1982_v25, %v1541_v24 }
  0x2d   :  { %733 = vmatpush.bf16.msra.mxu0 %v1366_v4  ;;  %v1413_v31 = vld [vmem:[#allocation5 + $0x80] sm:$0xf]  ;;  %v1950_v32 = vld [vmem:[#allocation5 + $0x84] sm:$0xf0]  ;;  %v1725_v33 = vld [vmem:[#allocation5 + $0x2f0] sm:$0xf]  ;;  %v1662_v43 = vor.u32 %v2012_v28, %v1661_v26  ;;  %v1410_v44 = vor.u32 %v1947_v29, %v1407_v30 }
  0x2e   :  { %759 = vmatpush.bf16.msra.mxu2 %v1494_v7  ;;  %v2028_v35 = vld [vmem:[#allocation5 + $0x2f4] sm:$0xf0]  ;;  %v1733_v36 = vld [vmem:[#allocation5 + $0x300] sm:$0xf]  ;;  %v2030_v37 = vld [vmem:[#allocation5 + $0x304] sm:$0xf0]  ;;  %v1414_v48 = vor.u32 %v1950_v32, %v1413_v31 }
  0x2f   :  { %772 = vmatpush.bf16.msra.mxu3 %v1558_v8  ;;  %v1963_v40 = vld [vmem:[#allocation5 + $0xf4] sm:$0xf]  ;;  %v1471_v41 = vld [vmem:[#allocation5 + $0xf8] sm:$0xf0]  ;;  %v1653_v42 = vld [vmem:[#allocation5 + $0x260] sm:$0xf]  ;;  %v1734_v50 = vor.u32 %v2030_v37, %v1733_v36  ;;  %v1726_v53 = vor.u32 %v2028_v35, %v1725_v33 }
  0x30   :  { %746 = vmatpush.bf16.msra.mxu1 %v1430_v12  ;;  %v2010_v45 = vld [vmem:[#allocation5 + $0x264] sm:$0xf0]  ;;  %v1945_v46 = vld [vmem:[#allocation5 + $0x64] sm:$0xf]  ;;  %v1399_v47 = vld [vmem:[#allocation5 + $0x68] sm:$0xf0]  ;;  %v1474_v56 = vor.u32 %v1963_v40, %v1471_v41 }
  0x31   :  { %734 = vmatpush.bf16.msra.mxu0 %v1358_v19  ;;  %v1717_v54 = vld [vmem:[#allocation5 + $0x2e0] sm:$0xf]  ;;  %v2026_v57 = vld [vmem:[#allocation5 + $0x2e4] sm:$0xf0]  ;;  %v1654_v60 = vor.u32 %v2010_v45, %v1653_v42  ;;  %v1402_v61 = vor.u32 %v1945_v46, %v1399_v47  ;;  %v1961_v62 = vld [vmem:[#allocation5 + $0xe4] sm:$0xf] }
  0x32   :  { %760 = vmatpush.bf16.msra.mxu2 %v1486_v22  ;;  %v111_v49 = vld.sshfl [vmem:[#allocation1 + $0x10] sm:$0xff pattern:$0x73625140]  ;;  %v109_v51 = vld.sshfl [vmem:[#allocation1] sm:$0xff pattern:$0x73625140]  ;;  %v1718_v6 = vor.u32 %v2026_v57, %v1717_v54 }
  0x33   :  { %773 = vmatpush.bf16.msra.mxu3 %v1550_v23  ;;  %v2307_v52 = vpack.c.bf16 %v111_v49, %v111_v49  ;;  %v112_v55 = vld.sshfl [vmem:[#allocation1 + $0x18] sm:$0xff pattern:$0x73625140]  ;;  %v2309_v58 = vpack.c.bf16 %v109_v51, %v109_v51  ;;  %v110_v59 = vld.sshfl [vmem:[#allocation1 + $0x8] sm:$0xff pattern:$0x73625140] }
  0x34   :  { %747 = vmatpush.bf16.msra.mxu1 %v1422_v27  ;;  %v1463_v63 = vld [vmem:[#allocation5 + $0xe8] sm:$0xf0]  ;;  %v1645_v0 = vld [vmem:[#allocation5 + $0x250] sm:$0xf]  ;;  %v2008_v1 = vld [vmem:[#allocation5 + $0x254] sm:$0xf0]  ;;  %v2311_v4 = vpack.c.bf16 %v112_v55, %v112_v55  ;;  %v2313_v5 = vpack.c.bf16 %v110_v59, %v110_v59 }
  0x35   :  { %735 = vmatpush.bf16.msra.mxu0 %v1350_v34  ;;  %v1943_v2 = vld [vmem:[#allocation5 + $0x54] sm:$0xf]  ;;  %v1391_v3 = vld [vmem:[#allocation5 + $0x58] sm:$0xf0]  ;;  %v1466_v7 = vor.u32 %v1961_v62, %v1463_v63  ;;  %v1709_v8 = vld [vmem:[#allocation5 + $0x2d0] sm:$0xf]  ;;  %v1646_v10 = vor.u32 %v2008_v1, %v1645_v0 }
  0x36   :  { %761 = vmatpush.bf16.msra.mxu2 %v1478_v38  ;;  %v2024_v9 = vld [vmem:[#allocation5 + $0x2d4] sm:$0xf0]  ;;  %v1394_v11 = vor.u32 %v1943_v2, %v1391_v3  ;;  %v1959_v12 = vld [vmem:[#allocation5 + $0xd4] sm:$0xf]  ;;  %v1455_v13 = vld [vmem:[#allocation5 + $0xd8] sm:$0xf0] }
  0x37   :  { %774 = vmatpush.bf16.msra.mxu3 %v1542_v39  ;;  %v1637_v14 = vld [vmem:[#allocation5 + $0x240] sm:$0xf]  ;;  %v2006_v15 = vld [vmem:[#allocation5 + $0x244] sm:$0xf0]  ;;  %v1941_v16 = vld [vmem:[#allocation5 + $0x44] sm:$0xf]  ;;  %v1710_v18 = vor.u32 %v2024_v9, %v1709_v8  ;;  %v1458_v19 = vor.u32 %v1959_v12, %v1455_v13 }
  0x38   :  { %748 = vmatpush.bf16.msra.mxu1 %v1414_v48  ;;  %736 = vmatmul.bf16.vlgmr.msra.gmra.mxu0 %v2309_v58  ;;  %v1383_v17 = vld [vmem:[#allocation5 + $0x48] sm:$0xf0]  ;;  %v1701_v20 = vld [vmem:[#allocation5 + $0x2c0] sm:$0xf]  ;;  %v2022_v21 = vld [vmem:[#allocation5 + $0x2c4] sm:$0xf0]  ;;  %v1638_v22 = vor.u32 %v2006_v15, %v1637_v14 }
  0x39   :  { %780 = vmatpush.bf16.msrb.mxu0 %v1662_v43  ;;  %762 = vmatmul.bf16.vlgmr.msra.gmra.mxu2 %v2307_v52  ;;  %v1386_v23 = vor.u32 %v1941_v16, %v1383_v17  ;;  %v1957_v24 = vld [vmem:[#allocation5 + $0xc4] sm:$0xf]  ;;  %v1447_v25 = vld [vmem:[#allocation5 + $0xc8] sm:$0xf0]  ;;  %v1629_v26 = vld [vmem:[#allocation5 + $0x230] sm:$0xf]  ;;  %v1702_v30 = vor.u32 %v2022_v21, %v1701_v20 }
  0x3a   :  { %813 = vmatpush.bf16.msrb.mxu2 %v1734_v50  ;;  %775 = vmatmul.bf16.vlgmr.msra.gmra.mxu3 %v2311_v4  ;;  %v2004_v27 = vld [vmem:[#allocation5 + $0x234] sm:$0xf0]  ;;  %v1939_v28 = vld [vmem:[#allocation5 + $0x34] sm:$0xf]  ;;  %v1375_v29 = vld [vmem:[#allocation5 + $0x38] sm:$0xf0]  ;;  %v1450_v32 = vor.u32 %v1957_v24, %v1447_v25 }
  0x3b   :  { %819 = vmatpush.bf16.msrb.mxu3 %v1410_v44  ;;  %749 = vmatmul.bf16.vlgmr.msra.gmra.mxu1 %v2313_v5  ;;  %v1693_v31 = vld [vmem:[#allocation5 + $0x2b0] sm:$0xf]  ;;  %v2020_v33 = vld [vmem:[#allocation5 + $0x2b4] sm:$0xf0]  ;;  %v1955_v34 = vld [vmem:[#allocation5 + $0xb4] sm:$0xf]  ;;  %v1630_v36 = vor.u32 %v2004_v27, %v1629_v26  ;;  %v1378_v37 = vor.u32 %v1939_v28, %v1375_v29 }
  0x3c   :  { %793 = vmatpush.bf16.msrb.mxu1 %v1726_v53  ;;  %v103_v35 = vld [vmem:[#allocation2 + $0x8] sm:$0x3f]  ;;  %v1621_v39 = vld [vmem:[#allocation5 + $0x220] sm:$0xf]  ;;  %v2002_v40 = vld [vmem:[#allocation5 + $0x224] sm:$0xf0]  ;;  %v1694_v43 = vor.u32 %v2020_v33, %v1693_v31 }
  0x3d   :  { %781 = vmatpush.bf16.msrb.mxu0 %v1654_v60  ;;  %v1439_v38 = vld [vmem:[#allocation5 + $0xb8] sm:$0xf0]  ;;  %108 = vst [vmem:[#allocation1 + $0x20] ss:$4 sm:$0xff] %v103_v35  ;;  %v1937_v41 = vld [vmem:[#allocation5 + $0x24] sm:$0xf]  ;;  %v1622_v48 = vor.u32 %v2002_v40, %v1621_v39 }
  0x3e   :  { %832 = vmatpush.bf16.msra.mxu2 %v1474_v56  ;;  %v1367_v42 = vld [vmem:[#allocation5 + $0x28] sm:$0xf0]  ;;  %v1442_v44 = vor.u32 %v1955_v34, %v1439_v38  ;;  %v1685_v45 = vld [vmem:[#allocation5 + $0x2a0] sm:$0xf]  ;;  %v2018_v46 = vld [vmem:[#allocation5 + $0x2a4] sm:$0xf0] }
  0x3f   :  { %820 = vmatpush.bf16.msrb.mxu3 %v1402_v61  ;;  %v1953_v47 = vld [vmem:[#allocation5 + $0xa4] sm:$0xf]  ;;  %v1370_v49 = vor.u32 %v1937_v41, %v1367_v42  ;;  %v1431_v50 = vld [vmem:[#allocation5 + $0xa8] sm:$0xf0]  ;;  %v1613_v51 = vld [vmem:[#allocation5 + $0x210] sm:$0xf]  ;;  %v1686_v57 = vor.u32 %v2018_v46, %v1685_v45 }
  0x40   :  { %794 = vmatpush.bf16.msrb.mxu1 %v1718_v6  ;;  %v2000_v53 = vld [vmem:[#allocation5 + $0x214] sm:$0xf0]  ;;  %v1935_v54 = vld [vmem:[#allocation5 + $0x14] sm:$0xf]  ;;  %v1359_v55 = vld [vmem:[#allocation5 + $0x18] sm:$0xf0]  ;;  %v1434_v62 = vor.u32 %v1953_v47, %v1431_v50 }
  0x41   :  { %782 = vmatpush.bf16.msrb.mxu0 %v1646_v10  ;;  %v1677_v56 = vld [vmem:[#allocation5 + $0x290] sm:$0xf]  ;;  %v2016_v59 = vld [vmem:[#allocation5 + $0x294] sm:$0xf0]  ;;  %v1951_v60 = vld [vmem:[#allocation5 + $0x94] sm:$0xf]  ;;  %v1614_v1 = vor.u32 %v2000_v53, %v1613_v51  ;;  %v1362_v2 = vor.u32 %v1935_v54, %v1359_v55 }
  0x42   :  { %833 = vmatpush.bf16.msra.mxu2 %v1466_v7  ;;  %v1423_v61 = vld [vmem:[#allocation5 + $0x98] sm:$0xf0]  ;;  %v1605_v63 = vld [vmem:[#allocation5 + $0x200] sm:$0xf]  ;;  %v1998_v3 = vld [vmem:[#allocation5 + $0x204] sm:$0xf0]  ;;  %v1678_v12 = vor.u32 %v2016_v59, %v1677_v56 }
  0x43   :  { %821 = vmatpush.bf16.msrb.mxu3 %v1394_v11  ;;  %v1933_v7 = vld [vmem:[#allocation5 + $0x4] sm:$0xf]  ;;  %v1351_v8 = vld [vmem:[#allocation5 + $0x8] sm:$0xf0]  ;;  %v1979_v9 = vld [vmem:[#allocation5 + $0x174] sm:$0xf]  ;;  %v1426_v16 = vor.u32 %v1951_v60, %v1423_v61  ;;  %v1606_v20 = vor.u32 %v1998_v3, %v1605_v63 }
  0x44   :  { %795 = vmatpush.bf16.msrb.mxu1 %v1710_v18  ;;  %v115_v0 = vld.sshfl [vmem:[#allocation1 + $0x30] sm:$0xff pattern:$0x73625140]  ;;  %v2011_v11 = vld [vmem:[#allocation5 + $0x274] sm:$0xf]  ;;  %v1354_v21 = vor.u32 %v1933_v7, %v1351_v8  ;;  %s1335_s9 = sshll.u32 %s2357_s7, 4  ;;  %s1336_s9 = int_to_ptr.hbm [resolvable:$true] %s1335_s9 }
  0x45   :  { %783 = vmatpush.bf16.msrb.mxu0 %v1638_v22  ;;  %v2319_v6 = vpack.c.bf16 %v115_v0, %v115_v0  ;;  %v1535_v10 = vld [vmem:[#allocation5 + $0x178] sm:$0xf0]  ;;  %v1669_v14 = vld [vmem:[#allocation5 + $0x280] sm:$0xf]  ;;  %v2014_v15 = vld [vmem:[#allocation5 + $0x284] sm:$0xf0] }
  0x46   :  { %834 = vmatpush.bf16.msra.mxu2 %v1458_v19  ;;  %v1663_v13 = vld [vmem:[#allocation5 + $0x278] sm:$0xf0]  ;;  %v1949_v17 = vld [vmem:[#allocation5 + $0x84] sm:$0xf]  ;;  %v1415_v18 = vld [vmem:[#allocation5 + $0x88] sm:$0xf0]  ;;  %v1538_v24 = vor.u32 %v1979_v9, %v1535_v10  ;;  %v1670_v29 = vor.u32 %v2014_v15, %v1669_v14 }
  0x47   :  { %822 = vmatpush.bf16.msrb.mxu3 %v1386_v23  ;;  %v1995_v19 = vld [vmem:[#allocation5 + $0x1f4] sm:$0xf]  ;;  %v113_v22 = vld.sshfl [vmem:[#allocation1 + $0x20] sm:$0xff pattern:$0x73625140]  ;;  %v1666_v25 = vor.u32 %v2011_v11, %v1663_v13  ;;  %v1418_v33 = vor.u32 %v1949_v17, %v1415_v18 }
  0x48   :  { %796 = vmatpush.bf16.msrb.mxu1 %v1702_v30  ;;  %v1599_v23 = vld [vmem:[#allocation5 + $0x1f8] sm:$0xf0]  ;;  %v2027_v26 = vld [vmem:[#allocation5 + $0x2f4] sm:$0xf]  ;;  %v1977_v28 = vld [vmem:[#allocation5 + $0x164] sm:$0xf] }
  0x49   :  { %784 = vmatpush.bf16.msrb.mxu0 %v1630_v36  ;;  %1739 = vmatmul.msk.bf16.vlgmr.msrb.gmra.mxu2 %vm724_vm0, %v2319_v6  ;;  %v1727_v27 = vld [vmem:[#allocation5 + $0x2f8] sm:$0xf0]  ;;  %v114_v30 = vld.sshfl [vmem:[#allocation1 + $0x28] sm:$0xff pattern:$0x73625140]  ;;  %v1602_v36 = vor.u32 %v1995_v19, %v1599_v23 }
  0x4a   :  { %835 = vmatpush.bf16.msra.mxu2 %v1450_v32  ;;  %v1527_v31 = vld [vmem:[#allocation5 + $0x168] sm:$0xf0]  ;;  %v2323_v32 = vpack.c.bf16 %v113_v22, %v113_v22  ;;  %v2009_v34 = vld [vmem:[#allocation5 + $0x264] sm:$0xf]  ;;  %v2325_v39 = vpack.c.bf16 %v114_v30, %v114_v30  ;;  %v1975_v45 = vld [vmem:[#allocation5 + $0x154] sm:$0xf] }
  0x4b   :  { %823 = vmatpush.bf16.msrb.mxu3 %v1378_v37  ;;  %v1655_v35 = vld [vmem:[#allocation5 + $0x268] sm:$0xf0]  ;;  %v1730_v37 = vor.u32 %v2027_v26, %v1727_v27  ;;  %v1993_v38 = vld [vmem:[#allocation5 + $0x1e4] sm:$0xf]  ;;  %v1530_v40 = vor.u32 %v1977_v28, %v1527_v31  ;;  %v1519_v46 = vld [vmem:[#allocation5 + $0x158] sm:$0xf0] }
  0x4c   :  { %797 = vmatpush.bf16.msrb.mxu1 %v1694_v43  ;;  %v1591_v41 = vld [vmem:[#allocation5 + $0x1e8] sm:$0xf0]  ;;  %v2025_v42 = vld [vmem:[#allocation5 + $0x2e4] sm:$0xf]  ;;  %v2007_v47 = vld [vmem:[#allocation5 + $0x254] sm:$0xf]  ;;  %v1522_v53 = vor.u32 %v1975_v45, %v1519_v46 }
  0x4d   :  { %785 = vmatpush.bf16.msrb.mxu0 %v1622_v48  ;;  %v1719_v43 = vld [vmem:[#allocation5 + $0x2e8] sm:$0xf0]  ;;  %v1647_v48 = vld [vmem:[#allocation5 + $0x258] sm:$0xf0]  ;;  %v1991_v51 = vld [vmem:[#allocation5 + $0x1d4] sm:$0xf] }
  0x4e   :  { %836 = vmatpush.bf16.msra.mxu2 %v1442_v44  ;;  %v1658_v44 = vor.u32 %v2009_v34, %v1655_v35  ;;  %v1722_v50 = vor.u32 %v2025_v42, %v1719_v43  ;;  %v1583_v54 = vld [vmem:[#allocation5 + $0x1d8] sm:$0xf0]  ;;  %v2023_v55 = vld [vmem:[#allocation5 + $0x2d4] sm:$0xf]  ;;  %v1973_v59 = vld [vmem:[#allocation5 + $0x144] sm:$0xf] }
  0x4f   :  { %824 = vmatpush.bf16.msrb.mxu3 %v1370_v49  ;;  %v1594_v49 = vor.u32 %v1993_v38, %v1591_v41  ;;  %v1711_v56 = vld [vmem:[#allocation5 + $0x2d8] sm:$0xf0]  ;;  %v1511_v60 = vld [vmem:[#allocation5 + $0x148] sm:$0xf0]  ;;  %v2005_v61 = vld [vmem:[#allocation5 + $0x244] sm:$0xf]  ;;  %v1586_v63 = vor.u32 %v1991_v51, %v1583_v54 }
  0x50   :  { %798 = vmatpush.bf16.msrb.mxu1 %v1686_v57  ;;  %v1650_v57 = vor.u32 %v2007_v47, %v1647_v48  ;;  %v1714_v0 = vor.u32 %v2023_v55, %v1711_v56  ;;  %v1514_v3 = vor.u32 %v1973_v59, %v1511_v60  ;;  %v2021_v7 = vld [vmem:[#allocation5 + $0x2c4] sm:$0xf]  ;;  %v1703_v8 = vld [vmem:[#allocation5 + $0x2c8] sm:$0xf0]  ;;  %v1971_v10 = vld [vmem:[#allocation5 + $0x134] sm:$0xf] }
  0x51   :  { %786 = vmatpush.bf16.msrb.mxu0 %v1614_v1  ;;  %v1989_v1 = vld [vmem:[#allocation5 + $0x1c4] sm:$0xf]  ;;  %v1503_v11 = vld [vmem:[#allocation5 + $0x138] sm:$0xf0]  ;;  %v1706_v14 = vor.u32 %v2021_v7, %v1703_v8  ;;  %v1987_v15 = vld [vmem:[#allocation5 + $0x1b4] sm:$0xf] }
  0x52   :  { %837 = vmatpush.bf16.msra.mxu2 %v1434_v62  ;;  %v1639_v62 = vld [vmem:[#allocation5 + $0x248] sm:$0xf0]  ;;  %v1631_v13 = vld [vmem:[#allocation5 + $0x238] sm:$0xf0]  ;;  %v2019_v18 = vld [vmem:[#allocation5 + $0x2b4] sm:$0xf] }
  0x53   :  { %825 = vmatpush.bf16.msrb.mxu3 %v1362_v2  ;;  %v1575_v2 = vld [vmem:[#allocation5 + $0x1c8] sm:$0xf0]  ;;  %v1642_v9 = vor.u32 %v2005_v61, %v1639_v62  ;;  %v1567_v17 = vld [vmem:[#allocation5 + $0x1b8] sm:$0xf0]  ;;  %v2001_v23 = vld [vmem:[#allocation5 + $0x224] sm:$0xf] }
  0x54   :  { %799 = vmatpush.bf16.msrb.mxu1 %v1678_v12  ;;  %v2003_v12 = vld [vmem:[#allocation5 + $0x234] sm:$0xf]  ;;  %v1695_v19 = vld [vmem:[#allocation5 + $0x2b8] sm:$0xf0]  ;;  %v1495_v22 = vld [vmem:[#allocation5 + $0x128] sm:$0xf0] }
  0x55   :  { %787 = vmatpush.bf16.msrb.mxu0 %v1606_v20  ;;  %v1634_v20 = vor.u32 %v2003_v12, %v1631_v13  ;;  %v1985_v26 = vld [vmem:[#allocation5 + $0x1a4] sm:$0xf]  ;;  %v1559_v28 = vld [vmem:[#allocation5 + $0x1a8] sm:$0xf0]  ;;  %v1487_v34 = vld [vmem:[#allocation5 + $0x118] sm:$0xf0] }
  0x56   :  { %838 = vmatpush.bf16.msra.mxu2 %v1426_v16  ;;  %v1506_v16 = vor.u32 %v1971_v10, %v1503_v11  ;;  %v1687_v30 = vld [vmem:[#allocation5 + $0x2a8] sm:$0xf0]  ;;  %v1999_v35 = vld [vmem:[#allocation5 + $0x214] sm:$0xf]  ;;  %v1551_v42 = vld [vmem:[#allocation5 + $0x198] sm:$0xf0] }
  0x57   :  { %826 = vmatpush.bf16.msrb.mxu3 %v1354_v21  ;;  %v1969_v21 = vld [vmem:[#allocation5 + $0x124] sm:$0xf]  ;;  %v2015_v43 = vld [vmem:[#allocation5 + $0x294] sm:$0xf]  ;;  %v1479_v47 = vld [vmem:[#allocation5 + $0x108] sm:$0xf0] }
  0x58   :  { %800 = vmatpush.bf16.msrb.mxu1 %v1670_v29  ;;  %788 = vmatmul.bf16.vlgmr.msrb.gmra.mxu0 %v2323_v32  ;;  %v1498_v27 = vor.u32 %v1969_v21, %v1495_v22  ;;  %v2017_v29 = vld [vmem:[#allocation5 + $0x2a4] sm:$0xf]  ;;  %v1735_v51 = vld [vmem:[#allocation5 + $0x308] sm:$0xf0]  ;;  %v1791_v10 = vld [vmem:[#allocation8 + $0x60] sm:$0xf] }
  0x59   :  { %845 = vmatpush.bf16.msra.mxu0 %v1538_v24  ;;  %v1570_v24 = vor.u32 %v1987_v15, %v1567_v17  ;;  %v1690_v38 = vor.u32 %v2017_v29, %v1687_v30  ;;  %v1965_v46 = vld [vmem:[#allocation5 + $0x104] sm:$0xf]  ;;  %v1671_v61 = vld [vmem:[#allocation5 + $0x288] sm:$0xf0]  ;;  %v2044_v11 = vld [vmem:[#allocation8 + $0x64] sm:$0xf0] }
  0x5a   :  { %839 = vmatpush.bf16.msra.mxu2 %v1418_v33  ;;  %827 = vmatmul.bf16.vlgmr.msrb.gmra.mxu3 %v2309_v58  ;;  %v1578_v58 = vor.u32 %v1989_v1, %v1575_v2  ;;  %v1967_v33 = vld [vmem:[#allocation5 + $0x114] sm:$0xf]  ;;  %v1997_v48 = vld [vmem:[#allocation5 + $0x204] sm:$0xf]  ;;  %v1482_v55 = vor.u32 %v1965_v46, %v1479_v47  ;;  %v2046_v2 = vld [vmem:[#allocation8 + $0x74] sm:$0xf0] }
  0x5b   :  { %871 = vmatpush.bf16.msra.mxu3 %v1666_v25  ;;  %801 = vmatmul.bf16.vlgmr.msrb.gmra.mxu1 %v2325_v39  ;;  %v1698_v25 = vor.u32 %v2019_v18, %v1695_v19  ;;  %v1490_v41 = vor.u32 %v1967_v33, %v1487_v34  ;;  %v1981_v56 = vld [vmem:[#allocation5 + $0x184] sm:$0xf]  ;;  %v1801_v8 = vld [vmem:[#allocation8 + $0x78] sm:$0xf0]  ;;  %v2043_v12 = vld [vmem:[#allocation8 + $0x64] sm:$0xf] }
  0x5c   :  { %858 = vmatpush.bf16.msra.mxu1 %v1602_v36  ;;  %v1615_v36 = vld [vmem:[#allocation5 + $0x218] sm:$0xf0]  ;;  %v2013_v60 = vld [vmem:[#allocation5 + $0x284] sm:$0xf]  ;;  %v1775_v15 = vld [vmem:[#allocation8 + $0x40] sm:$0xf] }
  0x5d   :  { %846 = vmatpush.bf16.msra.mxu0 %v1530_v40  ;;  %840 = vmatmul.bf16.vlgmr.msra.gmra.mxu2 %v2313_v5  ;;  %v1623_v5 = vld [vmem:[#allocation5 + $0x228] sm:$0xf0]  ;;  %v1983_v40 = vld [vmem:[#allocation5 + $0x194] sm:$0xf]  ;;  %v1618_v45 = vor.u32 %v1999_v35, %v1615_v36  ;;  %v1799_v1 = vld [vmem:[#allocation8 + $0x70] sm:$0xf] }
  0x5e   :  { %884 = vmatpush.bf16.msrb.mxu2 %v1730_v37  ;;  %v1626_v31 = vor.u32 %v2001_v23, %v1623_v5  ;;  %v1562_v37 = vor.u32 %v1985_v26, %v1559_v28  ;;  %v2045_v7 = vld [vmem:[#allocation8 + $0x74] sm:$0xf]  ;;  %v2039_v18 = vld [vmem:[#allocation8 + $0x44] sm:$0xf]  ;;  %v1777_v19 = vld [vmem:[#allocation8 + $0x48] sm:$0xf0] }
  0x5f   :  { %872 = vmatpush.bf16.msra.mxu3 %v1658_v44  ;;  %v1679_v44 = vld [vmem:[#allocation5 + $0x298] sm:$0xf0]  ;;  %v1780_v21 = vor.u32 %v2039_v18, %v1777_v19  ;;  %v1767_v22 = vld [vmem:[#allocation8 + $0x30] sm:$0xf]  ;;  %v2038_v23 = vld [vmem:[#allocation8 + $0x34] sm:$0xf0] }
  0x60   :  { %859 = vmatpush.bf16.msra.mxu1 %v1594_v49  ;;  %v1607_v49 = vld [vmem:[#allocation5 + $0x208] sm:$0xf0]  ;;  %v1682_v54 = vor.u32 %v2015_v43, %v1679_v44  ;;  %v2037_v5 = vld [vmem:[#allocation8 + $0x34] sm:$0xf]  ;;  %v2036_v28 = vld [vmem:[#allocation8 + $0x24] sm:$0xf0] }
  0x61   :  { %847 = vmatpush.bf16.msra.mxu0 %v1522_v53  ;;  %v1554_v53 = vor.u32 %v1983_v40, %v1551_v42  ;;  %v1610_v59 = vor.u32 %v1997_v48, %v1607_v49  ;;  %v2035_v29 = vld [vmem:[#allocation8 + $0x24] sm:$0xf]  ;;  %v1751_v34 = vld [vmem:[#allocation8 + $0x10] sm:$0xf]  ;;  %v2034_v35 = vld [vmem:[#allocation8 + $0x14] sm:$0xf0] }
  0x62   :  { %885 = vmatpush.bf16.msrb.mxu2 %v1722_v50  ;;  %v2029_v50 = vld [vmem:[#allocation5 + $0x304] sm:$0xf]  ;;  %v1743_v43 = vld [vmem:[#allocation8] sm:$0xf]  ;;  %v2032_v44 = vld [vmem:[#allocation8 + $0x4] sm:$0xf0] }
  0x63   :  { %873 = vmatpush.bf16.msra.mxu3 %v1650_v57  ;;  %v1543_v57 = vld [vmem:[#allocation5 + $0x188] sm:$0xf0]  ;;  %v1738_v62 = vor.u32 %v2029_v50, %v1735_v51  ;;  %v2033_v36 = vld [vmem:[#allocation8 + $0x14] sm:$0xf]  ;;  %v1744_v46 = vor.u32 %v2032_v44, %v1743_v43  ;;  %v1745_v47 = vld [vmem:[#allocation8 + $0x8] sm:$0xf0] }
  0x64   :  { %860 = vmatpush.bf16.msra.mxu1 %v1586_v63  ;;  %v1546_v63 = vor.u32 %v1981_v56, %v1543_v57  ;;  %v2337_v50 = vld [vmem:[#allocation7] sm:$0x3]  ;;  %v2062_v56 = vld [vmem:[#allocation8 + $0xf4] sm:$0xf0]  ;;  %v2061_v57 = vld [vmem:[#allocation8 + $0xf4] sm:$0xf] }
  0x65   :  { %848 = vmatpush.bf16.msra.mxu0 %v1514_v3  ;;  %v1800_v3 = vor.u32 %v2046_v2, %v1799_v1  ;;  %v2060_v1 = vld [vmem:[#allocation8 + $0xe4] sm:$0xf0]  ;;  %v2059_v2 = vld [vmem:[#allocation8 + $0xe4] sm:$0xf] }
  0x66   :  { %886 = vmatpush.bf16.msrb.mxu2 %v1714_v0  ;;  %v1674_v0 = vor.u32 %v2013_v60, %v1671_v61  ;;  %v1865_v61 = vld [vmem:[#allocation8 + $0xf8] sm:$0xf0] }
  0x67   :  { %874 = vmatpush.bf16.msra.mxu3 %v1642_v9  ;;  %v1804_v9 = vor.u32 %v2045_v7, %v1801_v8  ;;  %v1857_v8 = vld [vmem:[#allocation8 + $0xe8] sm:$0xf0] }
  0x68   :  { %861 = vmatpush.bf16.msra.mxu1 %v1578_v58  ;;  %v2041_v58 = vld [vmem:[#allocation8 + $0x54] sm:$0xf] }
  0x69   :  { %849 = vmatpush.bf16.msra.mxu0 %v1506_v16  ;;  %v2040_v16 = vld [vmem:[#allocation8 + $0x44] sm:$0xf0] }
  0x6a   :  { %887 = vmatpush.bf16.msrb.mxu2 %v1706_v14  ;;  %v1785_v14 = vld [vmem:[#allocation8 + $0x58] sm:$0xf0] }
  0x6b   :  { %875 = vmatpush.bf16.msra.mxu3 %v1634_v20  ;;  %v1788_v17 = vor.u32 %v2041_v58, %v1785_v14  ;;  %v1776_v20 = vor.u32 %v2040_v16, %v1775_v15  ;;  %v1839_v15 = vld [vmem:[#allocation8 + $0xc0] sm:$0xf]  ;;  %v2056_v16 = vld [vmem:[#allocation8 + $0xc4] sm:$0xf0] }
  0x6c   :  { %862 = vmatpush.bf16.msra.mxu1 %v1570_v24  ;;  %v1769_v24 = vld [vmem:[#allocation8 + $0x38] sm:$0xf0]  ;;  %v1840_v19 = vor.u32 %v2056_v16, %v1839_v15 }
  0x6d   :  { %850 = vmatpush.bf16.msra.mxu0 %v1498_v27  ;;  %v1772_v26 = vor.u32 %v2037_v5, %v1769_v24  ;;  %v1759_v27 = vld [vmem:[#allocation8 + $0x20] sm:$0xf]  ;;  %v1831_v24 = vld [vmem:[#allocation8 + $0xb0] sm:$0xf]  ;;  %v2070_v15 = vld [vmem:[#allocation10 + $0x38] sm:$0xff] }
  0x6e   :  { %888 = vmatpush.bf16.msrb.mxu2 %v1698_v25  ;;  %v1768_v25 = vor.u32 %v2038_v23, %v1767_v22  ;;  %v1760_v30 = vor.u32 %v2036_v28, %v1759_v27  ;;  %v1833_v28 = vld [vmem:[#allocation8 + $0xb8] sm:$0xf0] }
  0x6f   :  { %876 = vmatpush.bf16.msra.mxu3 %v1626_v31  ;;  %v1761_v31 = vld [vmem:[#allocation8 + $0x28] sm:$0xf0]  ;;  %v2078_v16 = vld [vmem:[#allocation10 + $0x78] sm:$0xff] }
  0x70   :  { %863 = vmatpush.bf16.msra.mxu1 %v1562_v37  ;;  %v1764_v33 = vor.u32 %v2035_v29, %v1761_v31  ;;  %v1752_v37 = vor.u32 %v2034_v35, %v1751_v34  ;;  %v1823_v34 = vld [vmem:[#allocation8 + $0xa0] sm:$0xf]  ;;  %v2052_v35 = vld [vmem:[#allocation8 + $0xa4] sm:$0xf0] }
  0x71   :  { %851 = vmatpush.bf16.msra.mxu0 %v1490_v41 }
  0x72   :  { %889 = vmatpush.bf16.msrb.mxu2 %v1690_v38  ;;  %v1753_v38 = vld [vmem:[#allocation8 + $0x18] sm:$0xf0] }
  0x73   :  { %877 = vmatpush.bf16.msra.mxu3 %v1618_v45  ;;  %v1756_v41 = vor.u32 %v2033_v36, %v1753_v38  ;;  %v2031_v45 = vld [vmem:[#allocation8 + $0x4] sm:$0xf] }
  0x74   :  { %864 = vmatpush.bf16.msra.mxu1 %v1554_v53  ;;  %v1748_v48 = vor.u32 %v2031_v45, %v1745_v47  ;;  %v2051_v38 = vld [vmem:[#allocation8 + $0xa4] sm:$0xf]  ;;  %v1815_v45 = vld [vmem:[#allocation8 + $0x90] sm:$0xf]  ;;  %v2049_v47 = vld [vmem:[#allocation8 + $0x94] sm:$0xf] }
  0x75   :  { %852 = vmatpush.bf16.msra.mxu0 %v1482_v55  ;;  %v1863_v55 = vld [vmem:[#allocation8 + $0xf0] sm:$0xf] }
  0x76   :  { %890 = vmatpush.bf16.msrb.mxu2 %v1682_v54  ;;  %v1864_v60 = vor.u32 %v2062_v56, %v1863_v55  ;;  %v2048_v55 = vld [vmem:[#allocation8 + $0x84] sm:$0xf0]  ;;  %v2047_v56 = vld [vmem:[#allocation8 + $0x84] sm:$0xf] }
  0x77   :  { %878 = vmatpush.bf16.msra.mxu3 %v1610_v59  ;;  %v230_v59 = vperm.slane %v2337_v50, 0 }
  0x78   :  { %865 = vmatpush.bf16.msra.mxu1 %v1546_v63  ;;  %853 = vmatmul.bf16.vlgmr.msra.gmra.mxu0 %v2307_v52  ;;  %v1792_v52 = vor.u32 %v2044_v11, %v1791_v10  ;;  %v1860_v10 = vor.u32 %v2059_v2, %v1857_v8 }
  0x79   :  { %904 = vmatpush.bf16.msrb.mxu0 %v1738_v62  ;;  %v1868_v62 = vor.u32 %v2061_v57, %v1865_v61 }
  0x7a   :  { %879 = vmatmul.bf16.vlgmr.msra.gmra.mxu3 %v2323_v32  ;;  %891 = vmatpush.bf16.msrb.mxu2 %v1674_v0  ;;  %v1793_v32 = vld [vmem:[#allocation8 + $0x68] sm:$0xf0]  ;;  %v1855_v0 = vld [vmem:[#allocation8 + $0xe0] sm:$0xf] }
  0x7b   :  { %866 = vmatmul.bf16.vlgmr.msra.gmra.mxu1 %v2311_v4  ;;  %v1796_v13 = vor.u32 %v2043_v12, %v1793_v32  ;;  %v1783_v4 = vld [vmem:[#allocation8 + $0x50] sm:$0xf]  ;;  %1125 = vmatpush.bf16.msrb.mxu3 %v1864_v60  ;;  %v1856_v7 = vor.u32 %v2060_v1, %v1855_v0  ;;  %v2058_v32 = vld [vmem:[#allocation8 + $0xd4] sm:$0xf0] }
  0x7c   :  { %1112 = vmatpush.bf16.msrb.mxu1 %v1800_v3 }
  0x7d   :  { %892 = vmatmul.bf16.vlgmr.msrb.gmra.mxu2 %v2325_v39  ;;  %1138 = vmatpush.bf16.msra.mxu0 %v1804_v9  ;;  %v2042_v39 = vld [vmem:[#allocation8 + $0x54] sm:$0xf0] }
  0x7e   :  { %1151 = vmatpush.bf16.msra.mxu2 %v1868_v62 }
  0x7f   :  { %1126 = vmatpush.bf16.msrb.mxu3 %v1856_v7 }
  0x80   :  { %1113 = vmatpush.bf16.msrb.mxu1 %v1792_v52  ;;  %v1847_v52 = vld [vmem:[#allocation8 + $0xd0] sm:$0xf] }
  0x81   :  { %1139 = vmatpush.bf16.msra.mxu0 %v1796_v13  ;;  %v2057_v13 = vld [vmem:[#allocation8 + $0xd4] sm:$0xf] }
  0x82   :  { %1152 = vmatpush.bf16.msra.mxu2 %v1860_v10 }
  0x85   :  { %1140 = vmatpush.bf16.msra.mxu0 %v1788_v17  ;;  %v2055_v17 = vld [vmem:[#allocation8 + $0xc4] sm:$0xf] }
  0x88   :  { %1740 = vmatmul.msk.bf16.vlgmr.msrb.gmra.mxu0 %vm724_vm0, %v2319_v6  ;;  %v1784_v6 = vor.u32 %v2042_v39, %v1783_v4  ;;  %v1848_v4 = vor.u32 %v2058_v32, %v1847_v52  ;;  %v1849_v39 = vld [vmem:[#allocation8 + $0xd8] sm:$0xf0] }
  0x89   :  { %1141 = vmatpush.bf16.msra.mxu0 %v1780_v21 }
  0x8a   :  { %1114 = vmatpush.bf16.msrb.mxu1 %v1784_v6  ;;  %v1852_v6 = vor.u32 %v2057_v13, %v1849_v39  ;;  %1127 = vmatpush.bf16.msrb.mxu3 %v1848_v4 }
  0x8c   :  { %1153 = vmatpush.bf16.msra.mxu2 %v1852_v6 }
  0x8d   :  { %1142 = vmatpush.bf16.msra.mxu0 %v1772_v26  ;;  %v2053_v26 = vld [vmem:[#allocation8 + $0xb4] sm:$0xf] }
  0x8e   :  { %1115 = vmatpush.bf16.msrb.mxu1 %v1776_v20  ;;  %v1841_v20 = vld [vmem:[#allocation8 + $0xc8] sm:$0xf0]  ;;  %1128 = vmatpush.bf16.msrb.mxu3 %v1840_v19  ;;  %v1836_v31 = vor.u32 %v2053_v26, %v1833_v28 }
  0x8f   :  { %v1844_v22 = vor.u32 %v2055_v17, %v1841_v20  ;;  %v2069_v17 = vld [vmem:[#allocation10 + $0x30] sm:$0xff]  ;;  %v2068_v19 = vld [vmem:[#allocation10 + $0x28] sm:$0xff] }
  0x90   :  { %v2076_v20 = vld [vmem:[#allocation10 + $0x68] sm:$0xff] }
  0x91   :  { %1143 = vmatpush.bf16.msra.mxu0 %v1764_v33  ;;  %1154 = vmatpush.bf16.msra.mxu2 %v1844_v22  ;;  %v2075_v22 = vld [vmem:[#allocation10 + $0x60] sm:$0xff] }
  0x92   :  { %1116 = vmatpush.bf16.msrb.mxu1 %v1768_v25  ;;  %v2054_v25 = vld [vmem:[#allocation8 + $0xb4] sm:$0xf0] }
  0x93   :  { %v1832_v27 = vor.u32 %v2054_v25, %v1831_v24  ;;  %v2065_v24 = vld [vmem:[#allocation10 + $0x10] sm:$0xff] }
  0x94   :  { %v2073_v25 = vld [vmem:[#allocation10 + $0x50] sm:$0xff] }
  0x95   :  { %1144 = vmatpush.bf16.msra.mxu0 %v1756_v41  ;;  %1129 = vmatpush.bf16.msrb.mxu3 %v1832_v27 }
  0x96   :  { %1117 = vmatpush.bf16.msrb.mxu1 %v1760_v30  ;;  %1155 = vmatpush.bf16.msra.mxu2 %v1836_v31  ;;  %v2072_v31 = vld [vmem:[#allocation10 + $0x48] sm:$0xff] }
  0x99   :  { %1145 = vmatpush.bf16.msra.mxu0 %v1748_v48 }
  0x9a   :  { %1118 = vmatpush.bf16.msrb.mxu1 %v1752_v37  ;;  %v1824_v37 = vor.u32 %v2052_v35, %v1823_v34  ;;  %v2071_v34 = vld [vmem:[#allocation10 + $0x40] sm:$0xff]  ;;  %v946_v35 = vld [vmem:[%s2354_s4] sm:$0x3]  ;;  %s2251_s4 = smov [#allocation11]  }
  0x9b   :  { %s1333_s29 = sshll.u32 %s2251_s4, 4  ;;  %s1334_s29 = int_to_ptr.vmem [resolvable:$true] %s1333_s29 }
  0x9c   :  { %1130 = vmatpush.bf16.msrb.mxu3 %v1824_v37  ;;  %v949_v37 = vperm.slane %v946_v35, 1 }
  0x9e   :  { %1119 = vmatpush.bf16.msrb.mxu1 %v1744_v46  ;;  %v2050_v46 = vld [vmem:[#allocation8 + $0x94] sm:$0xf0] }
  0x9f   :  { %v1816_v48 = vor.u32 %v2050_v46, %v1815_v45 }
  0xa1   :  { %1131 = vmatpush.bf16.msrb.mxu3 %v1816_v48 }
  0xa2   :  { %1300 = vmatpush.bf16.msra.mxu1 %v2070_v15 }
  0xa6   :  { %1301 = vmatpush.bf16.msra.mxu1 %v2069_v17 }
  0xaa   :  { %1302 = vmatpush.bf16.msra.mxu1 %v2068_v19 }
  0xb5   :  { %v737_v40 = vpop.f32.mrf.mxu0 }
  0xb6   :  { %v738_v3 = vadd.f32 %v737_v40, %v230_v59  ;;  %v1825_v40 = vld [vmem:[#allocation8 + $0xa8] sm:$0xf0] }
  0xb7   :  { %v1809_v59 = vld [vmem:[#allocation8 + $0x88] sm:$0xf0] }
  0xb8   :  { %v750_v42 = vpop.f32.mrf.mxu1  ;;  %v1812_v60 = vor.u32 %v2047_v56, %v1809_v59 }
  0xb9   :  { %v751_v11 = vadd.f32 %v750_v42, %v738_v3  ;;  %v1828_v42 = vor.u32 %v2051_v38, %v1825_v40 }
  0xbb   :  { %1156 = vmatpush.bf16.msra.mxu2 %v1828_v42 }
  0xbc   :  { %v763_v49 = vpop.f32.mrf.mxu2 }
  0xbd   :  { %v776_v51 = vpop.f32.mrf.mxu3  ;;  %v739_v53 = vpop.f32.mrf.mxu0  ;;  %v764_v12 = vadd.f32 %v763_v49, %v751_v11  ;;  %v1817_v49 = vld [vmem:[#allocation8 + $0x98] sm:$0xf0] }
  0xbe   :  { %v1820_v53 = vor.u32 %v2049_v47, %v1817_v49 }
  0xbf   :  { %v777_v14 = vadd.f32 %v776_v51, %v764_v12 }
  0xc0   :  { %v752_v54 = vpop.f32.mrf.mxu1  ;;  %1157 = vmatpush.bf16.msra.mxu2 %v1820_v53 }
  0xc1   :  { %v1807_v54 = vld [vmem:[#allocation8 + $0x80] sm:$0xf] }
  0xc2   :  { %v1808_v57 = vor.u32 %v2048_v55, %v1807_v54  ;;  %v2089_v54 = vld [vmem:[%s2356_s6] ss:$0 sm:$0xff] }
  0xc4   :  { %v765_v63 = vpop.f32.mrf.mxu2  ;;  %1132 = vmatpush.bf16.msrb.mxu3 %v1808_v57  ;;  %1158 = vmatpush.bf16.msra.mxu2 %v1812_v60 }
  0xc5   :  { %v778_v9 = vpop.f32.mrf.mxu3  ;;  %v231_v63 = vperm.slane %v2337_v50, 1 }
  0xc8   :  { %1313 = vmatpush.bf16.msra.mxu3 %v2078_v16 }
  0xcc   :  { %v815_v58 = vpop.f32.mrf.mxu2 }
  0xd4   :  { %v817_v30 = vpop.f32.mrf.mxu2 }
  0xd5   :  { %v789_v18 = vpop.f32.mrf.mxu0  ;;  %v2064_v30 = vld [vmem:[#allocation10 + $0x8] sm:$0xff] }
  0xd6   :  { %v790_v21 = vadd.f32 %v789_v18, %v777_v14  ;;  %v2077_v18 = vld [vmem:[#allocation10 + $0x70] sm:$0xff] }
  0xd7   :  { %1314 = vmatpush.bf16.msra.mxu3 %v2077_v18 }
  0xd8   :  { %v802_v23 = vpop.f32.mrf.mxu1 }
  0xd9   :  { %v803_v5 = vadd.f32 %v802_v23, %v790_v21  ;;  %v2067_v21 = vld [vmem:[#allocation10 + $0x20] sm:$0xff]  ;;  %v2066_v23 = vld [vmem:[#allocation10 + $0x18] sm:$0xff] }
  0xda   :  { %1303 = vmatpush.bf16.msra.mxu1 %v2067_v21 }
  0xdb   :  { %v816_v29 = vadd.f32 %v815_v58, %v803_v5  ;;  %1315 = vmatpush.bf16.msra.mxu3 %v2076_v20  ;;  %v2074_v5 = vld [vmem:[#allocation10 + $0x58] sm:$0xff] }
  0xdd   :  { %v910_v33 = vmax.f32 %v816_v29, 0.0  ;;  %v791_v36 = vpop.f32.mrf.mxu0  ;;  %v828_v43 = vpop.f32.mrf.mxu3 }
  0xde   :  { %v829_v0 = vadd.f32 %v828_v43, %v231_v63  ;;  %1304 = vmatpush.bf16.msra.mxu1 %v2066_v23  ;;  %v948_v36 = vperm.slane %v946_v35, 0 }
  0xdf   :  { %v912_v41 = vpack.c.bf16 %v910_v33, %v910_v33  ;;  %1316 = vmatpush.bf16.msra.mxu3 %v2075_v22  ;;  %v2063_v33 = vld [vmem:[#allocation10] sm:$0xff] }
  0xe0   :  { %v804_v44 = vpop.f32.mrf.mxu1  ;;  %v841_v51 = vpop.f32.mrf.mxu2 }
  0xe1   :  { %1120 = vmatmul.bf16.vlgmr.msrb.gmra.mxu1 %v912_v41  ;;  %1146 = vmatmul.bf16.vlgmr.msra.gmra.mxu0 %v912_v41  ;;  %v842_v2 = vadd.f32 %v841_v51, %v829_v0 }
  0xe2   :  { %1305 = vmatpush.bf16.msra.mxu1 %v2065_v24 }
  0xe3   :  { %1317 = vmatpush.bf16.msra.mxu3 %v2074_v5 }
  0xe5   :  { %v830_v61 = vpop.f32.mrf.mxu3 }
  0xe6   :  { %1306 = vmatpush.bf16.msra.mxu1 %v2064_v30 }
  0xe7   :  { %1318 = vmatpush.bf16.msra.mxu3 %v2073_v25 }
  0xe8   :  { %v843_v62 = vpop.f32.mrf.mxu2 }
  0xea   :  { %1307 = vmatpush.bf16.msra.mxu1 %v2063_v33 }
  0xeb   :  { %1319 = vmatpush.bf16.msra.mxu3 %v2072_v31 }
  0xef   :  { %1320 = vmatpush.bf16.msra.mxu3 %v2071_v34 }
  0xf5   :  { %v854_v1 = vpop.f32.mrf.mxu0 }
  0xf6   :  { %v855_v7 = vadd.f32 %v854_v1, %v842_v2 }
  0xf8   :  { %v867_v3 = vpop.f32.mrf.mxu1 }
  0xf9   :  { %v868_v10 = vadd.f32 %v867_v3, %v855_v7 }
  0xfd   :  { %v880_v8 = vpop.f32.mrf.mxu3  ;;  %v856_v9 = vpop.f32.mrf.mxu0 }
  0xfe   :  { %v881_v12 = vadd.f32 %v880_v8, %v868_v10 }
 0x100   :  { %v893_v11 = vpop.f32.mrf.mxu2  ;;  %v869_v52 = vpop.f32.mrf.mxu1 }
 0x101   :  { %v894_v32 = vadd.f32 %v893_v11, %v881_v12 }
 0x105   :  { %v882_v13 = vpop.f32.mrf.mxu3  ;;  %v906_v4 = vpop.f32.mrf.mxu0 }
 0x106   :  { %v907_v39 = vadd.f32 %v906_v4, %v894_v32 }
 0x108   :  { %v895_v58 = vpop.f32.mrf.mxu2  ;;  %v911_v6 = vmax.f32 %v907_v39, 0.0 }
 0x10a   :  { %v913_v14 = vpack.c.bf16 %v911_v6, %v911_v6 }
 0x10c   :  { %1133 = vmatmul.bf16.vlgmr.msrb.gmra.mxu3 %v913_v14  ;;  %1159 = vmatmul.bf16.vlgmr.msra.gmra.mxu2 %v913_v14 }
 0x10d   :  { %v908_v50 = vpop.f32.mrf.mxu0 }
 0x15e   :  { %v1121_v26 = vpop.f32.mrf.mxu1  ;;  %v1147_v27 = vpop.f32.mrf.mxu0 }
 0x15f   :  { %v1122_v38 = vadd.f32 %v1121_v26, %v948_v36  ;;  %v1148_v40 = vadd.f32 %v1147_v27, %v949_v37 }
 0x166   :  { %v1123_v28 = vpop.f32.mrf.mxu1  ;;  %v1149_v29 = vpop.f32.mrf.mxu0 }
 0x18f   :  { %v1134_v41 = vpop.f32.mrf.mxu3  ;;  %v1160_v42 = vpop.f32.mrf.mxu2 }
 0x190   :  { %v1135_v43 = vadd.f32 %v1134_v41, %v1122_v38  ;;  %v1161_v44 = vadd.f32 %v1160_v42, %v1148_v40 }
 0x192   :  { %v1164_v45 = vmax.f32 %v1135_v43, 0.0  ;;  %v1165_v46 = vmax.f32 %v1161_v44, 0.0 }
 0x194   :  { %v1166_v47 = vpack.c.bf16 %v1164_v45, %v1164_v45  ;;  %v1167_v48 = vpack.c.bf16 %v1165_v46, %v1165_v46 }
 0x196   :  { %1308 = vmatmul.bf16.vlgmr.msra.gmra.mxu1 %v1166_v47  ;;  %1321 = vmatmul.bf16.vlgmr.msra.gmra.mxu3 %v1167_v48 }
 0x197   :  { %v1136_v49 = vpop.f32.mrf.mxu3  ;;  %v1162_v51 = vpop.f32.mrf.mxu2 }
 0x213   :  { %v1309_v53 = vpop.f32.mrf.mxu1 }
 0x214   :  { %v1310_v55 = vadd.f32 %v2089_v54, %v1309_v53 }
 0x219   :  { %v1322_v56 = vpop.f32.mrf.mxu3 }
 0x21a   :  { %v1323_v57 = vadd.f32 %v1322_v56, %v1310_v55 }
 0x21b   :  { %v1311_v59 = vpop.f32.mrf.mxu1 }
 0x21c   :  { %v1326_v60 = vpack.c.bf16 %v1323_v57, %v1323_v57 }
 0x21e   :  { %1327 = vst [vmem:[#allocation11] sm:$0x1] %v1326_v60 }
 0x21f   :  { %1338 = dma.vmem_to_hbm [thread:$0]  %s1334_s29, 16, %s1336_s9, [#allocation4]  }
 0x221   :  { %v1324_v61 = vpop.f32.mrf.mxu3 }
 0x222   :  { %2240 = dma.done.wait [#allocation4], 16  }
 0x223   :  { %2241 = vsyncadd [#allocation4], 4294967280 }
 0x224   :  { %1343 = vsyncpa [#allocation3], 1 }
 0x225   :  { %1344 = vsyncpa [#allocation6], 1 }
 0x226   :  { %1345 = vsyncpa [#allocation9], 1 }
 0x227   :  { %1346 = vsyncpa [#allocation4], 1 }

</bundles_post_ra>
